<compile_context>
chip_gen: v5e
topology: v5e:2x2
jax: 0.10.0
libtpu: 0.0.40
codegen_flags: <defaults>
</compile_context>

<pallas_src>
import functools

import jax
import jax.numpy as jnp
from jax import lax
from jax.experimental import pallas as pl
from jax.experimental.pallas import tpu as pltpu


def _round_up(x, m):
    return -(-x // m) * m


def _multiloss_kernel(table_ref, pfec_ref, fs_ref, lp_ref, rec_ref, acc_ref, *,
                      num_levels, block_rows, rows_valid, needs_row_mask):
    """One grid step: fold a (block_rows, 128) tile of each per-frame vector into
    the resident (32, 128) accumulator:
        rows  0.. 7 : sum(diff^2 * recovery)
        rows  8..15 : sum(diff^2 * (1 - recovery))
        rows 16..23 : sum(fec_ratio)              (== sum(fec_packets/fs), fs > 0)
        rows 24..31 : count_nonzero(loss_packets) (== count_nonzero(lp/fs), fs > 0)
    """
    pid = pl.program_id(0)

    @pl.when(pid == 0)
    def _init():
        acc_ref[...] = jnp.zeros_like(acc_ref)

    fs = fs_ref[...]      # (block_rows, 128) frame sizes (packets)
    lp = lp_ref[...]      # (block_rows, 128) lost packets
    rec = rec_ref[...]    # (block_rows, 128) recovery status as 0/1 f32

    # Staircase gather: fec_ratio = pred_fec[searchsorted(table, fs, 'left') - 1],
    # with torch's negative-index wraparound (fs <= table[0] -> pred_fec[L-1]).
    # Table / pred_fec are SMEM scalars; no (L, N) arrays, cmp+select+add per level.
    ratio = jnp.where(fs > table_ref[0], pfec_ref[0], pfec_ref[num_levels - 1])
    for j in range(1, num_levels):            # unrolled: L is small and static
        ratio = ratio + jnp.where(fs > table_ref[j],
                                  pfec_ref[j] - pfec_ref[j - 1], 0.0)

    diff = lp - ratio * fs                    # loss_packets - fec_packets_num
    d2 = diff * diff
    d2_rec = d2 * rec
    d2_non = d2 - d2_rec
    nz = (lp != 0.0).astype(jnp.float32)

    if needs_row_mask:
        # Only generated when the grid tail overruns the array (garbage rows);
        # jnp.where (not multiply) so garbage NaNs do not propagate.
        row = pid * block_rows + lax.broadcasted_iota(
            jnp.int32, (block_rows, 128), 0)
        valid = row < rows_valid
        d2_rec = jnp.where(valid, d2_rec, 0.0)
        d2_non = jnp.where(valid, d2_non, 0.0)
        ratio = jnp.where(valid, ratio, 0.0)
        nz = jnp.where(valid, nz, 0.0)

    g = block_rows // 8

    def fold(x):  # (block_rows, 128) -> (8, 128); vreg-aligned reshape, VPU adds only
        if g == 1:
            return x
        return jnp.sum(x.reshape(g, 8, 128), axis=0)

    acc_ref[0:8, :] += fold(d2_rec)
    acc_ref[8:16, :] += fold(d2_non)
    acc_ref[16:24, :] += fold(ratio)
    acc_ref[24:32, :] += fold(nz)


def multiloss(pred_bitrate, pred_fec, fec_level_table,
              frame_size, loss_packets, recovery_status,
              alpha=1.0, beta=3.0, gamma=0.5, block_rows=1024):
    """Pallas implementation of Multiloss.forward.

    Precondition (as in the reference): frame_size > 0 elementwise.
    gamma is accepted but unused (as in the PyTorch module).
    """
    del gamma
    n = frame_size.shape[0]
    l = pred_fec.shape[0]
    assert block_rows % 8 == 0

    fs = frame_size.astype(jnp.float32).reshape(n)
    lp = loss_packets.astype(jnp.float32).reshape(n)
    rec = recovery_status.astype(jnp.float32).reshape(n)

    # Sublane/lane-dense layout: (rows, 128) f32 per vector.  Reshape is free when
    # n is a multiple of 1024; otherwise a single minimal zero-pad pass (<= 1023
    # elements).  The ragged grid tail is masked in-kernel, never padded to the
    # block boundary.
    n_arr = n if n % 1024 == 0 else _round_up(n, 1024)
    rows = n_arr // 128                       # multiple of 8
    blk = min(block_rows, rows)               # multiple of 8, <= rows
    num_blocks = pl.cdiv(rows, blk)
    needs_row_mask = (num_blocks * blk != rows)

    def prep(x):
        if n_arr != n:
            x = jnp.pad(x, (0, n_arr - n))
        return x.reshape(rows, 128)

    fs2, lp2, rec2 = prep(fs), prep(lp), prep(rec)
    table = fec_level_table.astype(jnp.float32).reshape(l)
    pfec = pred_fec.astype(jnp.float32).reshape(l)

    kernel = functools.partial(
        _multiloss_kernel, num_levels=l, block_rows=blk,
        rows_valid=rows, needs_row_mask=needs_row_mask)

    acc = pl.pallas_call(
        kernel,
        out_shape=jax.ShapeDtypeStruct((32, 128), jnp.float32),
        grid_spec=pltpu.PrefetchScalarGridSpec(
            num_scalar_prefetch=0,
            grid=(num_blocks,),
            in_specs=[
                pl.BlockSpec(memory_space=pltpu.MemorySpace.SMEM),  # fec table (L,)
                pl.BlockSpec(memory_space=pltpu.MemorySpace.SMEM),  # pred_fec  (L,)
                pl.BlockSpec((blk, 128), lambda i: (i, 0)),         # frame_size
                pl.BlockSpec((blk, 128), lambda i: (i, 0)),         # loss_packets
                pl.BlockSpec((blk, 128), lambda i: (i, 0)),         # recovery_status
            ],
            out_specs=pl.BlockSpec((32, 128), lambda i: (0, 0)),
        ),
        compiler_params=pltpu.CompilerParams(
            dimension_semantics=("arbitrary",)),
    )(table, pfec, fs2, lp2, rec2)

    # Final tiny reduction / combine on 16 KiB of partials (plain XLA).
    s_rec = jnp.sum(acc[0:8])
    s_non = jnp.sum(acc[8:16])
    s_ratio = jnp.sum(acc[16:24])
    s_cnt = jnp.sum(acc[24:32])

    if n_arr != n:
        # Zero-padded frames contribute pred_fec[searchsorted(table, 0)-1] each to
        # the ratio sum; remove that analytically.
        idx0 = jnp.searchsorted(table, jnp.float32(0.0), side="left") - 1
        idx0 = jnp.where(idx0 < 0, idx0 + l, idx0)
        s_ratio = s_ratio - jnp.float32(n_arr - n) * pfec[idx0]

    pb = jnp.asarray(pred_bitrate, jnp.float32).reshape(())
    inv_n = jnp.float32(1.0 / n)
    # TODO(synk): reference does `l2_norm[recovery_status]` on a 0-d tensor
    # (ill-formed); implemented the intended per-mask L2 norms instead.
    loss_fec_opt = alpha * jnp.sqrt(s_rec) + beta * jnp.sqrt(s_non)
    # TODO(synk): reference divides loss_rate by len(frame_result) (== 4 dict keys);
    # we divide by the number of frames N, which is the apparent intent.
    loss_reward = pb + s_ratio * inv_n
    loss_rate = s_cnt * inv_n
    return loss_fec_opt + loss_reward + loss_rate * pb


def multiloss_ref(pred_bitrate, pred_fec, fec_level_table,
                  frame_size, loss_packets, recovery_status,
                  alpha=1.0, beta=3.0):
    """Pure-JAX reference mirroring the (intended) PyTorch semantics."""
    l = pred_fec.shape[0]
    idx = jnp.searchsorted(fec_level_table, frame_size, side="left") - 1
    idx = jnp.where(idx < 0, idx + l, idx)
    fec_ratio = pred_fec[idx]
    fec_packets = fec_ratio * frame_size
    diff = loss_packets - fec_packets
    d2 = diff * diff
    rec = recovery_status.astype(jnp.float32)
    norm_rec = jnp.sqrt(jnp.sum(d2 * rec))
    norm_non = jnp.sqrt(jnp.sum(d2 * (1.0 - rec)))
    loss_fec_opt = alpha * norm_rec + beta * norm_non
    loss_reward = pred_bitrate + jnp.mean(fec_packets / frame_size)
    loss_rate = jnp.count_nonzero(loss_packets / frame_size) / frame_size.shape[0]
    return loss_fec_opt + loss_reward + loss_rate * pred_bitrate


if __name__ == "__main__":
    key = jax.random.PRNGKey(0)
    k_fec = jax.random.fold_in(key, 1)

    L = 8  # number of FEC levels
    fec_level_table = jnp.array([0., 5., 10., 20., 40., 80., 160., 320.],
                                dtype=jnp.float32)                      # sorted thresholds
    pred_fec = jax.random.uniform(k_fec, (L,), jnp.float32, 0.05, 0.5)  # per-level fec ratios
    pred_bitrate = jnp.float32(2.5)

    def run_case(n, block_rows):
        kf, kl, kr = jax.random.split(jax.random.fold_in(key, n), 3)
        frame_size = jax.random.randint(kf, (n,), 1, 300).astype(jnp.float32)
        loss_packets = jax.random.randint(kl, (n,), 0, 6).astype(jnp.float32)
        recovery_status = jax.random.bernoulli(kr, 0.7, (n,))
        out = multiloss(pred_bitrate, pred_fec, fec_level_table,
                        frame_size, loss_packets, recovery_status,
                        block_rows=block_rows)
        out = jax.block_until_ready(out)
        ref = multiloss_ref(pred_bitrate, pred_fec, fec_level_table,
                            frame_size, loss_packets, recovery_status)
        ref = jax.block_until_ready(ref)
        assert abs(float(out) - float(ref)) <= 1e-3 * max(1.0, abs(float(ref))), \
            (n, float(out), float(ref))

    # single block; exercises the lane-pad + analytic ratio correction
    run_case(256, 1024)
    # 2 blocks of (16,128); exercises padding, ragged grid tail + in-kernel row mask
    run_case(3000, 16)

    print("KERNEL_OK")
</pallas_src>

<mosaic_0001>
module attributes {stable_mosaic.version = 11 : i64} {
  func.func @_multiloss_kernel(%arg0: i32, %arg1: memref<8xf32, #tpu.memory_space<smem>>, %arg2: memref<8xf32, #tpu.memory_space<smem>>, %arg3: memref<8x128xf32, #tpu.memory_space<vmem>>, %arg4: memref<8x128xf32, #tpu.memory_space<vmem>>, %arg5: memref<8x128xf32, #tpu.memory_space<vmem>>, %arg6: memref<32x128xf32, #tpu.memory_space<vmem>>) attributes {dimension_semantics = [#tpu.dimension_semantics<arbitrary>], iteration_bounds = array<i64: 1>, scalar_prefetch = 0 : i64, scratch_operands = 0 : i64, tpu.core_type = #tpu.core_type<tc>, window_params = [{transform_indices = @transform_0, window_bounds = array<i64: 8>}, {transform_indices = @transform_1, window_bounds = array<i64: 8>}, {transform_indices = @transform_2, window_bounds = array<i64: 8, 128>}, {transform_indices = @transform_3, window_bounds = array<i64: 8, 128>}, {transform_indices = @transform_4, window_bounds = array<i64: 8, 128>}, {pipeline_mode = #tpu.pipeline_mode<synchronous>, transform_indices = @transform_5, window_bounds = array<i64: 32, 128>}]} {
    %c0_i32 = arith.constant 0 : i32
    %0 = arith.cmpi eq, %arg0, %c0_i32 : i32
    %1 = arith.extui %0 : i1 to i32
    %c0_i32_0 = arith.constant 0 : i32
    %2 = arith.cmpi ne, %1, %c0_i32_0 : i32
    scf.if %2 {
      %cst_43 = arith.constant 0.000000e+00 : f32
      %105 = vector.broadcast %cst_43 : f32 to vector<32x128xf32>
      %c0_44 = arith.constant 0 : index
      %c0_45 = arith.constant 0 : index
      %106 = vector.load %arg6[%c0_44, %c0_45] : memref<32x128xf32, #tpu.memory_space<vmem>>, vector<32x128xf32>
      tpu.vector_store %arg6[%c0_44, %c0_45], %105 {strides = array<i32>} : memref<32x128xf32, #tpu.memory_space<vmem>>, vector<32x128xf32>,
    } else {
    }
    %c0 = arith.constant 0 : index
    %c0_1 = arith.constant 0 : index
    %3 = vector.load %arg3[%c0, %c0_1] : memref<8x128xf32, #tpu.memory_space<vmem>>, vector<8x128xf32>
    %c0_2 = arith.constant 0 : index
    %c0_3 = arith.constant 0 : index
    %4 = vector.load %arg4[%c0_2, %c0_3] : memref<8x128xf32, #tpu.memory_space<vmem>>, vector<8x128xf32>
    %c0_4 = arith.constant 0 : index
    %c0_5 = arith.constant 0 : index
    %5 = vector.load %arg5[%c0_4, %c0_5] : memref<8x128xf32, #tpu.memory_space<vmem>>, vector<8x128xf32>
    %c0_6 = arith.constant 0 : index
    %6 = memref.load %arg1[%c0_6] : memref<8xf32, #tpu.memory_space<smem>>
    %7 = vector.broadcast %6 : f32 to vector<8x128xf32>
    %8 = arith.cmpf ogt, %3, %7 : vector<8x128xf32>
    %c0_7 = arith.constant 0 : index
    %9 = memref.load %arg2[%c0_7] : memref<8xf32, #tpu.memory_space<smem>>
    %c7 = arith.constant 7 : index
    %10 = memref.load %arg2[%c7] : memref<8xf32, #tpu.memory_space<smem>>
    %11 = vector.broadcast %9 : f32 to vector<8x128xf32>
    %12 = vector.broadcast %10 : f32 to vector<8x128xf32>
    %13 = arith.select %8, %11, %12 : vector<8x128xi1>, vector<8x128xf32>
    %c1 = arith.constant 1 : index
    %14 = memref.load %arg1[%c1] : memref<8xf32, #tpu.memory_space<smem>>
    %15 = vector.broadcast %14 : f32 to vector<8x128xf32>
    %16 = arith.cmpf ogt, %3, %15 : vector<8x128xf32>
    %c1_8 = arith.constant 1 : index
    %17 = memref.load %arg2[%c1_8] : memref<8xf32, #tpu.memory_space<smem>>
    %c0_9 = arith.constant 0 : index
    %18 = memref.load %arg2[%c0_9] : memref<8xf32, #tpu.memory_space<smem>>
    %19 = arith.subf %17, %18 : f32
    %cst = arith.constant 0.000000e+00 : f32
    %20 = vector.broadcast %19 : f32 to vector<8x128xf32>
    %21 = vector.broadcast %cst : f32 to vector<8x128xf32>
    %22 = arith.select %16, %20, %21 : vector<8x128xi1>, vector<8x128xf32>
    %23 = arith.addf %13, %22 : vector<8x128xf32>
    %c2 = arith.constant 2 : index
    %24 = memref.load %arg1[%c2] : memref<8xf32, #tpu.memory_space<smem>>
    %25 = vector.broadcast %24 : f32 to vector<8x128xf32>
    %26 = arith.cmpf ogt, %3, %25 : vector<8x128xf32>
    %c2_10 = arith.constant 2 : index
    %27 = memref.load %arg2[%c2_10] : memref<8xf32, #tpu.memory_space<smem>>
    %c1_11 = arith.constant 1 : index
    %28 = memref.load %arg2[%c1_11] : memref<8xf32, #tpu.memory_space<smem>>
    %29 = arith.subf %27, %28 : f32
    %cst_12 = arith.constant 0.000000e+00 : f32
    %30 = vector.broadcast %29 : f32 to vector<8x128xf32>
    %31 = vector.broadcast %cst_12 : f32 to vector<8x128xf32>
    %32 = arith.select %26, %30, %31 : vector<8x128xi1>, vector<8x128xf32>
    %33 = arith.addf %23, %32 : vector<8x128xf32>
    %c3 = arith.constant 3 : index
    %34 = memref.load %arg1[%c3] : memref<8xf32, #tpu.memory_space<smem>>
    %35 = vector.broadcast %34 : f32 to vector<8x128xf32>
    %36 = arith.cmpf ogt, %3, %35 : vector<8x128xf32>
    %c3_13 = arith.constant 3 : index
    %37 = memref.load %arg2[%c3_13] : memref<8xf32, #tpu.memory_space<smem>>
    %c2_14 = arith.constant 2 : index
    %38 = memref.load %arg2[%c2_14] : memref<8xf32, #tpu.memory_space<smem>>
    %39 = arith.subf %37, %38 : f32
    %cst_15 = arith.constant 0.000000e+00 : f32
    %40 = vector.broadcast %39 : f32 to vector<8x128xf32>
    %41 = vector.broadcast %cst_15 : f32 to vector<8x128xf32>
    %42 = arith.select %36, %40, %41 : vector<8x128xi1>, vector<8x128xf32>
    %43 = arith.addf %33, %42 : vector<8x128xf32>
    %c4 = arith.constant 4 : index
    %44 = memref.load %arg1[%c4] : memref<8xf32, #tpu.memory_space<smem>>
    %45 = vector.broadcast %44 : f32 to vector<8x128xf32>
    %46 = arith.cmpf ogt, %3, %45 : vector<8x128xf32>
    %c4_16 = arith.constant 4 : index
    %47 = memref.load %arg2[%c4_16] : memref<8xf32, #tpu.memory_space<smem>>
    %c3_17 = arith.constant 3 : index
    %48 = memref.load %arg2[%c3_17] : memref<8xf32, #tpu.memory_space<smem>>
    %49 = arith.subf %47, %48 : f32
    %cst_18 = arith.constant 0.000000e+00 : f32
    %50 = vector.broadcast %49 : f32 to vector<8x128xf32>
    %51 = vector.broadcast %cst_18 : f32 to vector<8x128xf32>
    %52 = arith.select %46, %50, %51 : vector<8x128xi1>, vector<8x128xf32>
    %53 = arith.addf %43, %52 : vector<8x128xf32>
    %c5 = arith.constant 5 : index
    %54 = memref.load %arg1[%c5] : memref<8xf32, #tpu.memory_space<smem>>
    %55 = vector.broadcast %54 : f32 to vector<8x128xf32>
    %56 = arith.cmpf ogt, %3, %55 : vector<8x128xf32>
    %c5_19 = arith.constant 5 : index
    %57 = memref.load %arg2[%c5_19] : memref<8xf32, #tpu.memory_space<smem>>
    %c4_20 = arith.constant 4 : index
    %58 = memref.load %arg2[%c4_20] : memref<8xf32, #tpu.memory_space<smem>>
    %59 = arith.subf %57, %58 : f32
    %cst_21 = arith.constant 0.000000e+00 : f32
    %60 = vector.broadcast %59 : f32 to vector<8x128xf32>
    %61 = vector.broadcast %cst_21 : f32 to vector<8x128xf32>
    %62 = arith.select %56, %60, %61 : vector<8x128xi1>, vector<8x128xf32>
    %63 = arith.addf %53, %62 : vector<8x128xf32>
    %c6 = arith.constant 6 : index
    %64 = memref.load %arg1[%c6] : memref<8xf32, #tpu.memory_space<smem>>
    %65 = vector.broadcast %64 : f32 to vector<8x128xf32>
    %66 = arith.cmpf ogt, %3, %65 : vector<8x128xf32>
    %c6_22 = arith.constant 6 : index
    %67 = memref.load %arg2[%c6_22] : memref<8xf32, #tpu.memory_space<smem>>
    %c5_23 = arith.constant 5 : index
    %68 = memref.load %arg2[%c5_23] : memref<8xf32, #tpu.memory_space<smem>>
    %69 = arith.subf %67, %68 : f32
    %cst_24 = arith.constant 0.000000e+00 : f32
    %70 = vector.broadcast %69 : f32 to vector<8x128xf32>
    %71 = vector.broadcast %cst_24 : f32 to vector<8x128xf32>
    %72 = arith.select %66, %70, %71 : vector<8x128xi1>, vector<8x128xf32>
    %73 = arith.addf %63, %72 : vector<8x128xf32>
    %c7_25 = arith.constant 7 : index
    %74 = memref.load %arg1[%c7_25] : memref<8xf32, #tpu.memory_space<smem>>
    %75 = vector.broadcast %74 : f32 to vector<8x128xf32>
    %76 = arith.cmpf ogt, %3, %75 : vector<8x128xf32>
    %c7_26 = arith.constant 7 : index
    %77 = memref.load %arg2[%c7_26] : memref<8xf32, #tpu.memory_space<smem>>
    %c6_27 = arith.constant 6 : index
    %78 = memref.load %arg2[%c6_27] : memref<8xf32, #tpu.memory_space<smem>>
    %79 = arith.subf %77, %78 : f32
    %cst_28 = arith.constant 0.000000e+00 : f32
    %80 = vector.broadcast %79 : f32 to vector<8x128xf32>
    %81 = vector.broadcast %cst_28 : f32 to vector<8x128xf32>
    %82 = arith.select %76, %80, %81 : vector<8x128xi1>, vector<8x128xf32>
    %83 = arith.addf %73, %82 : vector<8x128xf32>
    %84 = arith.mulf %83, %3 : vector<8x128xf32>
    %85 = arith.subf %4, %84 : vector<8x128xf32>
    %86 = arith.mulf %85, %85 : vector<8x128xf32>
    %87 = arith.mulf %86, %5 : vector<8x128xf32>
    %88 = arith.subf %86, %87 : vector<8x128xf32>
    %cst_29 = arith.constant 0.000000e+00 : f32
    %89 = vector.broadcast %cst_29 : f32 to vector<8x128xf32>
    %90 = arith.cmpf one, %4, %89 : vector<8x128xf32>
    %91 = arith.extui %90 : vector<8x128xi1> to vector<8x128xi32>
    %92 = arith.sitofp %91 : vector<8x128xi32> to vector<8x128xf32>
    %c0_30 = arith.constant 0 : index
    %c0_31 = arith.constant 0 : index
    %93 = vector.load %arg6[%c0_30, %c0_31] : memref<32x128xf32, #tpu.memory_space<vmem>>, vector<8x128xf32>
    %94 = arith.addf %93, %87 : vector<8x128xf32>
    %c0_32 = arith.constant 0 : index
    %c0_33 = arith.constant 0 : index
    %95 = vector.load %arg6[%c0_32, %c0_33] : memref<32x128xf32, #tpu.memory_space<vmem>>, vector<8x128xf32>
    tpu.vector_store %arg6[%c0_32, %c0_33], %94 {strides = array<i32>} : memref<32x128xf32, #tpu.memory_space<vmem>>, vector<8x128xf32>,
    %c8 = arith.constant 8 : index
    %c0_34 = arith.constant 0 : index
    %96 = vector.load %arg6[%c8, %c0_34] : memref<32x128xf32, #tpu.memory_space<vmem>>, vector<8x128xf32>
    %97 = arith.addf %96, %88 : vector<8x128xf32>
    %c8_35 = arith.constant 8 : index
    %c0_36 = arith.constant 0 : index
    %98 = vector.load %arg6[%c8_35, %c0_36] : memref<32x128xf32, #tpu.memory_space<vmem>>, vector<8x128xf32>
    tpu.vector_store %arg6[%c8_35, %c0_36], %97 {strides = array<i32>} : memref<32x128xf32, #tpu.memory_space<vmem>>, vector<8x128xf32>,
    %c16 = arith.constant 16 : index
    %c0_37 = arith.constant 0 : index
    %99 = vector.load %arg6[%c16, %c0_37] : memref<32x128xf32, #tpu.memory_space<vmem>>, vector<8x128xf32>
    %100 = arith.addf %99, %83 : vector<8x128xf32>
    %c16_38 = arith.constant 16 : index
    %c0_39 = arith.constant 0 : index
    %101 = vector.load %arg6[%c16_38, %c0_39] : memref<32x128xf32, #tpu.memory_space<vmem>>, vector<8x128xf32>
    tpu.vector_store %arg6[%c16_38, %c0_39], %100 {strides = array<i32>} : memref<32x128xf32, #tpu.memory_space<vmem>>, vector<8x128xf32>,
    %c24 = arith.constant 24 : index
    %c0_40 = arith.constant 0 : index
    %102 = vector.load %arg6[%c24, %c0_40] : memref<32x128xf32, #tpu.memory_space<vmem>>, vector<8x128xf32>
    %103 = arith.addf %102, %92 : vector<8x128xf32>
    %c24_41 = arith.constant 24 : index
    %c0_42 = arith.constant 0 : index
    %104 = vector.load %arg6[%c24_41, %c0_42] : memref<32x128xf32, #tpu.memory_space<vmem>>, vector<8x128xf32>
    tpu.vector_store %arg6[%c24_41, %c0_42], %103 {strides = array<i32>} : memref<32x128xf32, #tpu.memory_space<vmem>>, vector<8x128xf32>,
    return
  }
  func.func @transform_0(%arg0: i32) -> i32 {
    %c0_i32 = arith.constant 0 : i32
    %c0_i32_0 = arith.constant 0 : i32
    return %c0_i32 : i32
  }
  func.func @transform_1(%arg0: i32) -> i32 {
    %c0_i32 = arith.constant 0 : i32
    %c0_i32_0 = arith.constant 0 : i32
    return %c0_i32 : i32
  }
  func.func @transform_2(%arg0: i32) -> (i32, i32) {
    %c0_i32 = arith.constant 0 : i32
    %c0_i32_0 = arith.constant 0 : i32
    return %arg0, %c0_i32 : i32, i32
  }
  func.func @transform_3(%arg0: i32) -> (i32, i32) {
    %c0_i32 = arith.constant 0 : i32
    %c0_i32_0 = arith.constant 0 : i32
    return %arg0, %c0_i32 : i32, i32
  }
  func.func @transform_4(%arg0: i32) -> (i32, i32) {
    %c0_i32 = arith.constant 0 : i32
    %c0_i32_0 = arith.constant 0 : i32
    return %arg0, %c0_i32 : i32, i32
  }
  func.func @transform_5(%arg0: i32) -> (i32, i32) {
    %c0_i32 = arith.constant 0 : i32
    %c0_i32_0 = arith.constant 0 : i32
    %c0_i32_1 = arith.constant 0 : i32
    return %c0_i32, %c0_i32_0 : i32, i32
  }
}

</mosaic_0001>

<bundles_post_ra>
// kernel: tpu_custom_call.1
= control target key start
LH: loop header
LB: loop body
LE: loop exit
PB: predicated region body
PF: predicated region fallthrough
CT: control target
= control target key end

     0   :  { %10 = vsyncpa [#allocation5], 0  ;;  %s445_s0 = inlined_call_operand.hbm [shape: f32[8], index: 0, kind: input, shape index: {}]   ;;  %s446_s1 = inlined_call_operand.hbm [shape: f32[8], index: 1, kind: input, shape index: {}]   ;;  %s447_s2 = inlined_call_operand.hbm [shape: f32[8,128], index: 2, kind: input, shape index: {}]   ;;  %s448_s3 = inlined_call_operand.hbm [shape: f32[8,128], index: 3, kind: input, shape index: {}]   ;;  %s449_s4 = inlined_call_operand.hbm [shape: f32[8,128], index: 4, kind: input, shape index: {}]   ;;  %s450_s5 = inlined_call_operand.hbm [shape: f32[32,128], index: 5, kind: output, shape index: {}]  }
   0x1   :  { %11 = vsyncpa [#allocation7], 0 }
   0x2   :  { %12 = vsyncpa [#allocation3], 0 }
   0x3   :  { %13 = vsyncpa [#allocation10], 0  ;;  %s49_s20 = sshll.u32 %s448_s3, 4  ;;  %s50_s20 = int_to_ptr.hbm [resolvable:$true] %s49_s20 }
   0x4   :  { %14 = vsyncpa [#allocation4], 0  ;;  %s357_s21 = smov [#allocation9]   ;;  %s20_s25 = sshll.u32 %s445_s0, 4  ;;  %s21_s25 = int_to_ptr.hbm [resolvable:$true] %s20_s25 }
   0x5   :  { %s51_s22 = sshll.u32 %s357_s21, 4  ;;  %s358_s26 = smov [#allocation2]   ;;  %s52_s22 = int_to_ptr.vmem [resolvable:$true] %s51_s22 }
   0x6   :  { %54 = dma.hbm_to_vmem [thread:$0]  %s50_s20, 128, %s52_s22, [#allocation10]  }
   0x7   :  { %23 = dma.hbm_to_smem %s21_s25, 16, %s358_s26, [#allocation5]  }
   0x8   :  { %s29_s29 = sshll.u32 %s446_s1, 4  ;;  %s38_s6 = sshll.u32 %s447_s2, 4  ;;  %s30_s29 = int_to_ptr.hbm [resolvable:$true] %s29_s29  ;;  %s39_s6 = int_to_ptr.hbm [resolvable:$true] %s38_s6 }
   0x9   :  { %s359_s7 = smov [#allocation6]   ;;  %s360_s8 = smov [#allocation8]  }
   0xa   :  { %32 = dma.hbm_to_smem %s30_s29, 16, %s359_s7, [#allocation7]  }
   0xb   :  { %s40_s9 = sshll.u32 %s360_s8, 4  ;;  %s60_s11 = sshll.u32 %s449_s4, 4  ;;  %s41_s9 = int_to_ptr.vmem [resolvable:$true] %s40_s9  ;;  %s61_s11 = int_to_ptr.hbm [resolvable:$true] %s60_s11 }
   0xc   :  { %43 = dma.hbm_to_vmem [thread:$0]  %s39_s6, 128, %s41_s9, [#allocation3]  }
   0xd   :  { %s361_s12 = smov [#allocation11]  }
   0xe   :  { %s62_s13 = sshll.u32 %s361_s12, 4  ;;  %s63_s13 = int_to_ptr.vmem [resolvable:$true] %s62_s13 }
   0xf   :  { %65 = dma.hbm_to_vmem [thread:$0]  %s61_s11, 128, %s63_s13, [#allocation10]  }
  0x10   :  { %347 = dma.done.wait [#allocation5], 16  }
  0x11   :  { %348 = vsyncadd [#allocation5], 4294967280 }
  0x12   :  { %349 = dma.done.wait [#allocation7], 16  }
  0x13   :  { %350 = vsyncadd [#allocation7], 4294967280 }
  0x14   :  { %351 = dma.done.wait [#allocation3], 128  }
  0x15   :  { %352 = vsyncadd [#allocation3], 4294967168 }
  0x16   :  { %353 = dma.done.wait [#allocation10], 256  }
  0x17   :  { %354 = vsyncadd [#allocation10], 4294967040 }
  0x18   :  { %86 = sfence }
  0x19   :  { %s98_s1 = sld [smem:[#allocation2]]  ;;  %v415_v0 = vld [vmem:[#allocation8] sm:$0xff]  ;;  %v96_v2 = vld [vmem:[#allocation9] sm:$0xff]  ;;  %v362_v6 = vmov 0.0   ;;  %v97_v38 = vld [vmem:[#allocation11] sm:$0xff]  ;;  %s363_s8 = smov [#allocation12]  }
  0x1a   :  { %s101_s2 = sld [smem:[#allocation6]]  ;;  %vm166_vm1 = vcmp.ne.f32.partialorder %v96_v2, 0.0  ;;  %s185_s9 = sshll.u32 %s363_s8, 4  ;;  %s186_s9 = int_to_ptr.vmem [resolvable:$true] %s185_s9 }
  0x1b   :  { %s411_s14 = sld [smem:[#allocation6 + $0x7]]  ;;  %v217_v7 = vsel %vm166_vm1, 1.0, %v362_v6  ;;  %s187_s11 = sshll.u32 %s450_s5, 4  ;;  %s188_s11 = int_to_ptr.hbm [resolvable:$true] %s187_s11 }
  0x1c   :  { %s204_s4 = sld [smem:[#allocation2 + $0x1]]  ;;  %180 = vst [vmem:[#allocation12 + $0x18] sm:$0xff] %v217_v7  ;;  %s364_s12 = smov 128  }
  0x1d   :  { %s413_s15 = sld [smem:[#allocation6 + $0x1]]  ;;  %s365_s13 = smov 8  }
  0x1e   :  { %s206_s16 = sld [smem:[#allocation2 + $0x2]] }
  0x1f   :  { %v99_v1 = vstv %s98_s1  ;;  %s417_s17 = sld [smem:[#allocation6 + $0x2]] }
  0x20   :  { %s208_s18 = sld [smem:[#allocation2 + $0x3]]  ;;  %vm100_vm0 = vcmp.gt.f32.partialorder %v415_v0, %v99_v1  ;;  %v103_v3 = vstv %s101_s2 }
  0x21   :  { %v104_v4 = vstv %s411_s14  ;;  %s421_s19 = sld [smem:[#allocation6 + $0x3]] }
  0x22   :  { %v107_v5 = vstv %s204_s4  ;;  %s210_s20 = sld [smem:[#allocation2 + $0x4]]  ;;  %v105_v8 = vsel %vm100_vm0, %v103_v3, %v104_v4 }
  0x23   :  { %vm108_vm2 = vcmp.gt.f32.partialorder %v415_v0, %v107_v5  ;;  %s110_s21 = ssub.f32 %s413_s15, %s101_s2 }
  0x24   :  { %v115_v9 = vstv %s206_s16  ;;  %s425_s22 = sld [smem:[#allocation6 + $0x4]] }
  0x25   :  { %v111_v10 = vstv %s110_s21  ;;  %vm116_vm3 = vcmp.gt.f32.partialorder %v415_v0, %v115_v9  ;;  %s118_s23 = ssub.f32 %s417_s17, %s413_s15 }
  0x26   :  { %v112_v11 = vsel %vm108_vm2, %v111_v10, 0.0  ;;  %v123_v12 = vstv %s208_s18  ;;  %s212_s24 = sld [smem:[#allocation2 + $0x5]] }
  0x27   :  { %v113_v13 = vadd.f32 %v112_v11, %v105_v8  ;;  %v119_v14 = vstv %s118_s23  ;;  %vm124_vm4 = vcmp.gt.f32.partialorder %v415_v0, %v123_v12  ;;  %s126_s25 = ssub.f32 %s421_s19, %s417_s17 }
  0x28   :  { %v120_v15 = vsel %vm116_vm3, %v119_v14, 0.0  ;;  %v131_v16 = vstv %s210_s20  ;;  %s213_s26 = sld [smem:[#allocation6 + $0x5]] }
  0x29   :  { %v121_v17 = vadd.f32 %v120_v15, %v113_v13  ;;  %v127_v18 = vstv %s126_s25  ;;  %s214_s27 = sld [smem:[#allocation2 + $0x6]]  ;;  %vm132_vm5 = vcmp.gt.f32.partialorder %v415_v0, %v131_v16 }
  0x2a   :  { %v128_v19 = vsel %vm124_vm4, %v127_v18, 0.0  ;;  %s134_s28 = ssub.f32 %s425_s22, %s421_s19 }
  0x2b   :  { %v129_v20 = vadd.f32 %v128_v19, %v121_v17  ;;  %s215_s29 = sld [smem:[#allocation6 + $0x6]] }
  0x2c   :  { %v135_v21 = vstv %s134_s28  ;;  %v139_v22 = vstv %s212_s24  ;;  %s216_s30 = sld [smem:[#allocation2 + $0x7]] }
  0x2d   :  { %v136_v23 = vsel %vm132_vm5, %v135_v21, 0.0  ;;  %vm140_vm6 = vcmp.gt.f32.partialorder %v415_v0, %v139_v22 }
  0x2e   :  { %v137_v24 = vadd.f32 %v136_v23, %v129_v20  ;;  %s142_s3 = ssub.f32 %s213_s26, %s425_s22 }
  0x2f   :  { %v147_v25 = vstv %s214_s27 }
  0x30   :  { %v143_v26 = vstv %s142_s3  ;;  %vm148_vm7 = vcmp.gt.f32.partialorder %v415_v0, %v147_v25 }
  0x31   :  { %v144_v27 = vsel %vm140_vm6, %v143_v26, 0.0  ;;  %s150_s6 = ssub.f32 %s215_s29, %s213_s26 }
  0x32   :  { %v145_v28 = vadd.f32 %v144_v27, %v137_v24  ;;  %v155_v29 = vstv %s216_s30  ;;  %s157_s7 = ssub.f32 %s411_s14, %s215_s29 }
  0x33   :  { %v151_v30 = vstv %s150_s6  ;;  %vm156_vm8 = vcmp.gt.f32.partialorder %v415_v0, %v155_v29 }
  0x34   :  { %v152_v31 = vsel %vm148_vm7, %v151_v30, 0.0  ;;  %v158_v32 = vstv %s157_s7 }
  0x35   :  { %v153_v33 = vadd.f32 %v152_v31, %v145_v28  ;;  %v159_v34 = vsel %vm156_vm8, %v158_v32, 0.0 }
  0x37   :  { %v160_v35 = vadd.f32 %v159_v34, %v153_v33 }
  0x39   :  { %v161_v36 = vmul.f32 %v160_v35, %v415_v0  ;;  %177 = vst [vmem:[#allocation12 + $0x10] sm:$0xff] %v160_v35 }
  0x3b   :  { %v162_v37 = vsub.f32 %v96_v2, %v161_v36 }
  0x3d   :  { %v163_v39 = vmul.f32 %v162_v37, %v162_v37 }
  0x3f   :  { %v164_v40 = vmul.f32 %v163_v39, %v97_v38 }
  0x41   :  { %v165_v41 = vsub.f32 %v163_v39, %v164_v40  ;;  %171 = vst [vmem:[#allocation12] sm:$0xff] %v164_v40 }
  0x43   :  { %174 = vst [vmem:[#allocation12 + $0x8] sm:$0xff] %v165_v41 }
  0x44   :  { %193 = dma.vmem_to_hbm [thread:$0]  %s186_s9, 512, %s188_s11, [#allocation4], %s364_s12, %s364_s12, %s365_s13  }
  0x45   :  { %355 = dma.done.wait [#allocation4], 512  }
  0x46   :  { %356 = vsyncadd [#allocation4], 4294966784 }
  0x47   :  { %198 = vsyncpa [#allocation3], 1 }
  0x48   :  { %199 = vsyncpa [#allocation10], 1 }
  0x49   :  { %200 = vsyncpa [#allocation4], 1 }
  0x4a   :  { %201 = vsyncpa [#allocation5], 1 }
  0x4b   :  { %202 = vsyncpa [#allocation7], 1 }

</bundles_post_ra>
